<compile_context>
chip_gen: v6e
topology: v6e:2x2x1
jax: 0.10.0
libtpu: 0.0.40
codegen_flags: <defaults>
</compile_context>

<pallas_src>
import functools

import jax
import jax.numpy as jnp
from jax import lax
from jax.experimental import pallas as pl
from jax.experimental.pallas import tpu as pltpu


def _self_attention_kernel(x_ref, w_ref, b_ref, o_ref, *, matmul_dtype, exact_recip):
    x = x_ref[0]                                   # (C, N), channel-major, lane-dense in N
    C = x.shape[0]
    ROW = w_ref.shape[0] // 3                      # 8-sublane-aligned row-group size

    # Fused 1x1 convolutions: (3*ROW, C) @ (C, N) + (3*ROW, 1).
    # Row groups: [0:ROW) = q (+zero pad), [ROW:2*ROW) = k (+zero pad),
    # [2*ROW:3*ROW) = gamma*v with row C = all-ones (zero weights, bias 1) -> softmax sums.
    qkv = jnp.dot(w_ref[...], x, preferred_element_type=jnp.float32) + b_ref[...]

    # Aligned ROW-group slices (free views); padded rows are exactly zero.
    q = qkv[0:ROW].astype(matmul_dtype)            # (ROW, N)
    k = qkv[ROW:2 * ROW].astype(matmul_dtype)      # (ROW, N)
    v_aug = qkv[2 * ROW:3 * ROW].astype(matmul_dtype)   # (ROW, N): rows 0:C = gamma*v, row C = 1

    # scores[i, j] = sum_c q[c, i] * k[c, j] — contract the sublane dim of both operands;
    # the MXU takes the transposed LHS directly, no materialized (N, C) q.T.
    s = lax.dot_general(q, k, (((0,), (0,)), ((), ())),
                        preferred_element_type=jnp.float32)             # (N, N)

    # Numerically stable softmax numerator; normalization deferred past the PV matmul.
    s = s - jnp.max(s, axis=-1, keepdims=True)
    # bf16 path: exp directly at bf16 (EUP/VPU bf16-native on v6e/v7x; avoids a separate
    # f32->bf16 pack of the full (N, N) tile). f32 path: this astype is a no-op.
    p = jnp.exp(s.astype(matmul_dtype))                                  # (N, N)

    # out_aug[r, i] = sum_j v_aug[r, j] * p[i, j]; row C carries rowsum(p) per query i.
    out_aug = lax.dot_general(v_aug, p, (((1,), (1,)), ((), ())),
                              preferred_element_type=jnp.float32)        # (ROW, N)

    # Softmax normalization after the PV matmul: scales ROW*N values instead of N*N.
    # Exact reciprocal on the f32 path (correctness), approx EUP reciprocal on bf16.
    inv = pl.reciprocal(out_aug[C:C + 1], approx=not exact_recip)        # (1, N)
    out = out_aug[0:C] * inv                                             # (C, N), gamma folded in

    o_ref[0] = (x + out).astype(o_ref.dtype)


def self_attention_pallas(x_nchw, wq, wk, wv, bq, bk, bv, gamma,
                          *, matmul_dtype=jnp.bfloat16):
    """x_nchw: (B, C, H, W) float32. Weights: (C, C); biases: (C,); gamma: scalar.

    matmul_dtype: operand dtype for the two large (N, N) MXU matmuls. bf16 (default) is the
    native MXU rate on v5e/v6e/v7x; f32 gives a near-bit-exact match to the reference.
    Accumulation is always f32.
    """
    B, C, H, W = x_nchw.shape
    N = H * W

    # Channel-major token layout: NCHW -> (B, C, N) is a free reshape (no HBM transpose).
    x_bcn = x_nchw.reshape(B, C, N)

    gamma_s = jnp.asarray(gamma, jnp.float32).reshape(())

    # Fused, sublane-aligned weight/bias. ROW >= C+1 so the ones row fits in the v group.
    ROW = -(-(C + 1) // 8) * 8
    w_fused = jnp.zeros((3 * ROW, C), jnp.float32)
    w_fused = w_fused.at[0:C].set(wq)
    w_fused = w_fused.at[ROW:ROW + C].set(wk)
    w_fused = w_fused.at[2 * ROW:2 * ROW + C].set(gamma_s * wv)   # gamma folded into v

    b_fused = jnp.zeros((3 * ROW, 1), jnp.float32)
    b_fused = b_fused.at[0:C, 0].set(bq)
    b_fused = b_fused.at[ROW:ROW + C, 0].set(bk)
    b_fused = b_fused.at[2 * ROW:2 * ROW + C, 0].set(gamma_s * bv)
    b_fused = b_fused.at[2 * ROW + C, 0].set(1.0)   # ones row (NOT gamma-scaled) -> row-sums

    exact_recip = jnp.dtype(matmul_dtype) == jnp.dtype(jnp.float32)
    kernel = functools.partial(_self_attention_kernel,
                               matmul_dtype=matmul_dtype, exact_recip=exact_recip)

    # Advisory cost hint so XLA schedules sensibly around this tiny custom call.
    cost = pl.CostEstimate(
        flops=B * (2 * 3 * ROW * C * N + 4 * ROW * N * N),
        transcendentals=B * (N * N + N),
        bytes_accessed=2 * B * C * N * 4 + 3 * ROW * (C + 1) * 4,
    )

    out_bcn = pl.pallas_call(
        kernel,
        out_shape=jax.ShapeDtypeStruct((B, C, N), x_bcn.dtype),
        grid_spec=pltpu.PrefetchScalarGridSpec(
            num_scalar_prefetch=0,
            grid=(B,),
            in_specs=[
                pl.BlockSpec((1, C, N), lambda b: (b, 0, 0)),      # x (per-image tile)
                pl.BlockSpec((3 * ROW, C), lambda b: (0, 0)),      # fused Wq/Wk/gamma*Wv(+ones)
                pl.BlockSpec((3 * ROW, 1), lambda b: (0, 0)),      # fused bias
            ],
            out_specs=pl.BlockSpec((1, C, N), lambda b: (b, 0, 0)),
        ),
        compiler_params=pltpu.CompilerParams(
            dimension_semantics=("parallel",)),
        cost_estimate=cost,
    )(x_bcn, w_fused, b_fused)

    # (B, C, N) -> NCHW is again a free reshape.
    return out_bcn.reshape(B, C, H, W)


def self_attention_ref(x_nchw, wq, wk, wv, bq, bk, bv, gamma):
    """Pure-JAX reference mirroring the PyTorch forward exactly."""
    B, C, H, W = x_nchw.shape
    N = H * W
    xf = x_nchw.reshape(B, C, N)                                    # (B, C, N)
    q = jnp.einsum('oc,bcn->bon', wq, xf) + bq[None, :, None]
    k = jnp.einsum('oc,bcn->bon', wk, xf) + bk[None, :, None]
    v = jnp.einsum('oc,bcn->bon', wv, xf) + bv[None, :, None]
    att = jnp.einsum('bci,bcj->bij', q, k)                          # (B, N, N)
    att = jax.nn.softmax(att, axis=-1)
    out = jnp.einsum('bcj,bij->bci', v, att)                        # (B, C, N)
    out = out.reshape(B, C, H, W)
    return x_nchw + gamma * out


if __name__ == "__main__":
    B, C, H, W = 2, 4, 16, 16
    key = jax.random.PRNGKey(0)
    kx, kq, kk, kv, kbq, kbk, kbv = jax.random.split(key, 7)

    x = jax.random.normal(kx, (B, C, H, W), jnp.float32)

    # Parameter shapes follow nn.Conv2d(C, C, 1): weight (C, C, 1, 1) -> (C, C), bias (C,).
    scale = 1.0 / jnp.sqrt(C)
    wq = jax.random.normal(kq, (C, C), jnp.float32) * scale
    wk = jax.random.normal(kk, (C, C), jnp.float32) * scale
    wv = jax.random.normal(kv, (C, C), jnp.float32) * scale
    bq = jax.random.normal(kbq, (C,), jnp.float32) * 0.1
    bk = jax.random.normal(kbk, (C,), jnp.float32) * 0.1
    bv = jax.random.normal(kbv, (C,), jnp.float32) * 0.1
    gamma = jnp.float32(0.5)   # nn.Parameter(torch.zeros(1)); nonzero so attention path is exercised

    y_ref = self_attention_ref(x, wq, wk, wv, bq, bk, bv, gamma)

    # f32 MXU operands + exact reciprocal: near-bit-exact vs the reference.
    y_f32 = self_attention_pallas(x, wq, wk, wv, bq, bk, bv, gamma, matmul_dtype=jnp.float32)
    jax.block_until_ready(y_f32)
    assert y_f32.shape == (B, C, H, W)
    assert jnp.allclose(y_f32, y_ref, atol=1e-3, rtol=1e-3), \
        f"f32 max abs err = {jnp.max(jnp.abs(y_f32 - y_ref))}"

    # Default bf16 MXU operands (native rate on v5e/v6e/v7x), f32 accumulation.
    y_bf16 = self_attention_pallas(x, wq, wk, wv, bq, bk, bv, gamma)
    jax.block_until_ready(y_bf16)
    assert jnp.allclose(y_bf16, y_ref, atol=5e-2, rtol=5e-2), \
        f"bf16 max abs err = {jnp.max(jnp.abs(y_bf16 - y_ref))}"

    print("KERNEL_OK")
</pallas_src>

<mosaic_0001>
module attributes {stable_mosaic.version = 11 : i64} {
  func.func @_self_attention_kernel(%arg0: i32, %arg1: memref<1x4x256xf32, #tpu.memory_space<vmem>>, %arg2: memref<24x4xf32, #tpu.memory_space<vmem>>, %arg3: memref<24x1xf32, #tpu.memory_space<vmem>>, %arg4: memref<1x4x256xf32, #tpu.memory_space<vmem>>) attributes {dimension_semantics = [#tpu.dimension_semantics<parallel>], iteration_bounds = array<i64: 2>, scalar_prefetch = 0 : i64, scratch_operands = 0 : i64, tpu.core_type = #tpu.core_type<tc>, window_params = [{transform_indices = @transform_0, window_bounds = array<i64: 1, 4, 256>}, {pipeline_mode = #tpu.pipeline_mode<synchronous>, transform_indices = @transform_1, window_bounds = array<i64: 24, 4>}, {pipeline_mode = #tpu.pipeline_mode<synchronous>, transform_indices = @transform_2, window_bounds = array<i64: 24, 1>}, {transform_indices = @transform_3, window_bounds = array<i64: 1, 4, 256>}]} {
    %c0 = arith.constant 0 : index
    %c0_0 = arith.constant 0 : index
    %c0_1 = arith.constant 0 : index
    %0 = vector.load %arg1[%c0, %c0_0, %c0_1] : memref<1x4x256xf32, #tpu.memory_space<vmem>>, vector<1x4x256xf32>
    %1 = vector.shape_cast %0 : vector<1x4x256xf32> to vector<4x256xf32>
    %c0_2 = arith.constant 0 : index
    %c0_3 = arith.constant 0 : index
    %2 = vector.load %arg2[%c0_2, %c0_3] : memref<24x4xf32, #tpu.memory_space<vmem>>, vector<24x4xf32>
    %cst = arith.constant dense<0.000000e+00> : vector<24x256xf32>
    %3 = tpu.matmul %2, %1, %cst {dimension_numbers = #tpu.dot_dimension_numbers<[1], [0], [0], [1], [0, 0, 1, 1], [], []>} : vector<24x4xf32>, vector<4x256xf32>, vector<24x256xf32> -> vector<24x256xf32>
    %c0_4 = arith.constant 0 : index
    %c0_5 = arith.constant 0 : index
    %4 = vector.load %arg3[%c0_4, %c0_5] : memref<24x1xf32, #tpu.memory_space<vmem>>, vector<24x1xf32>
    %5 = vector.broadcast %4 : vector<24x1xf32> to vector<24x256xf32>
    %6 = arith.addf %3, %5 : vector<24x256xf32>
    %7 = vector.extract_strided_slice %6 {offsets = [0, 0], sizes = [8, 256], strides = [1, 1]} : vector<24x256xf32> to vector<8x256xf32>
    %8 = vector.extract_strided_slice %6 {offsets = [8, 0], sizes = [8, 256], strides = [1, 1]} : vector<24x256xf32> to vector<8x256xf32>
    %9 = vector.extract_strided_slice %6 {offsets = [16, 0], sizes = [8, 256], strides = [1, 1]} : vector<24x256xf32> to vector<8x256xf32>
    %cst_6 = arith.constant dense<0.000000e+00> : vector<256x256xf32>
    %10 = tpu.matmul %7, %8, %cst_6 {dimension_numbers = #tpu.dot_dimension_numbers<[0], [0], [1], [1], [0, 1, 1, 1], [], []>} : vector<8x256xf32>, vector<8x256xf32>, vector<256x256xf32> -> vector<256x256xf32>
    %cst_7 = arith.constant dense<0xFF800000> : vector<256xf32>
    %11 = vector.multi_reduction <maximumf>, %10, %cst_7 [1] : vector<256x256xf32> to vector<256xf32>
    %12 = vector.shape_cast %11 : vector<256xf32> to vector<256x1xf32>
    %13 = vector.broadcast %12 : vector<256x1xf32> to vector<256x256xf32>
    %14 = arith.subf %10, %13 : vector<256x256xf32>
    %15 = math.exp %14 : vector<256x256xf32>
    %cst_8 = arith.constant dense<0.000000e+00> : vector<8x256xf32>
    %16 = tpu.matmul %9, %15, %cst_8 {dimension_numbers = #tpu.dot_dimension_numbers<[1], [1], [0], [0], [0, 0, 1, 0], [], []>} : vector<8x256xf32>, vector<256x256xf32>, vector<8x256xf32> -> vector<8x256xf32>
    %17 = vector.extract_strided_slice %16 {offsets = [4, 0], sizes = [1, 256], strides = [1, 1]} : vector<8x256xf32> to vector<1x256xf32>
    %18 = tpu.reciprocal %17 : vector<1x256xf32> -> vector<1x256xf32>
    %19 = vector.extract_strided_slice %16 {offsets = [0, 0], sizes = [4, 256], strides = [1, 1]} : vector<8x256xf32> to vector<4x256xf32>
    %20 = vector.broadcast %18 : vector<1x256xf32> to vector<4x256xf32>
    %21 = arith.mulf %19, %20 : vector<4x256xf32>
    %22 = arith.addf %1, %21 : vector<4x256xf32>
    %c0_9 = arith.constant 0 : index
    %c0_10 = arith.constant 0 : index
    %c0_11 = arith.constant 0 : index
    %23 = vector.load %arg4[%c0_9, %c0_10, %c0_11] : memref<1x4x256xf32, #tpu.memory_space<vmem>>, vector<1x4x256xf32>
    %24 = vector.shape_cast %23 : vector<1x4x256xf32> to vector<4x256xf32>
    %25 = vector.shape_cast %22 : vector<4x256xf32> to vector<1x4x256xf32>
    tpu.vector_store %arg4[%c0_9, %c0_10, %c0_11], %25 {strides = array<i32>} : memref<1x4x256xf32, #tpu.memory_space<vmem>>, vector<1x4x256xf32>,
    return
  }
  func.func @transform_0(%arg0: i32) -> (i32, i32, i32) {
    %c0_i32 = arith.constant 0 : i32
    %c0_i32_0 = arith.constant 0 : i32
    %c0_i32_1 = arith.constant 0 : i32
    return %arg0, %c0_i32, %c0_i32_0 : i32, i32, i32
  }
  func.func @transform_1(%arg0: i32) -> (i32, i32) {
    %c0_i32 = arith.constant 0 : i32
    %c0_i32_0 = arith.constant 0 : i32
    %c0_i32_1 = arith.constant 0 : i32
    return %c0_i32, %c0_i32_0 : i32, i32
  }
  func.func @transform_2(%arg0: i32) -> (i32, i32) {
    %c0_i32 = arith.constant 0 : i32
    %c0_i32_0 = arith.constant 0 : i32
    %c0_i32_1 = arith.constant 0 : i32
    return %c0_i32, %c0_i32_0 : i32, i32
  }
  func.func @transform_3(%arg0: i32) -> (i32, i32, i32) {
    %c0_i32 = arith.constant 0 : i32
    %c0_i32_0 = arith.constant 0 : i32
    %c0_i32_1 = arith.constant 0 : i32
    return %arg0, %c0_i32, %c0_i32_0 : i32, i32, i32
  }
}

</mosaic_0001>

<bundles_post_ra>
// kernel: tpu_custom_call.1
= control target key start
LH: loop header
LB: loop body
LE: loop exit
PB: predicated region body
PF: predicated region fallthrough
CT: control target
= control target key end

     0   :  { %8 = vsyncpa [#allocation3], 0  ;;  %s1907_s0 = inlined_call_operand.vmem [shape: f32[2,4,256], index: 0, kind: input, shape index: {}]   ;;  %s1908_s1 = inlined_call_operand.vmem [shape: f32[24,4], index: 1, kind: input, shape index: {}]   ;;  %s1909_s2 = inlined_call_operand.vmem [shape: f32[24,1], index: 2, kind: input, shape index: {}]   ;;  %s1910_s3 = inlined_call_operand.hbm [shape: f32[2,4,256], index: 3, kind: output, shape index: {}]  }
   0x1   :  { %10 = vsyncpa [#allocation3 + $0x1], 0  ;;  %s1472_s12 = smov 0   ;;  %s1474_s13 = smov 0  }
   0x2   :  { %s1476_s14 = smov 0   ;;  %s1478_s15 = smov 0  }
   0x3 LB: > { %s1493_s16 = sadd.s32 4294967295, %s1447_s15   ;;  %s1160_s17 = sadd.s32 4294967294, %s1447_s15   ;;  %s1447_s15 = sphi %s1478_s15, %s1952_s15   ;;  %s1443_s14 = sphi %s1476_s14, %s1951_s14   ;;  %s1439_s13 = sphi %s1474_s13, %s1950_s13   ;;  %s1435_s12 = sphi %s1472_s12, %s1949_s12  }
   0x4   : > { %s1497_s18 = sadd.s32 1, %s1447_s15   ;;  %s91_s19 = sadd.s32 1, %s1443_s14 }
   0x5   : > { %s88_s20 = ssub.s32 %s1447_s15, %s1497_s18  ;;  %p101_p0 = scmp.ne.s32.totalorder %s1443_s14, %s1439_s13 }
   0x6   : > { %p89_p1 = scmp.eq.s32.totalorder %s88_s20, 0  ;;  %p102_p2 = scmp.eq.s32.totalorder %s1493_s16, 1 }
   0x7   : > { %p107_p3 = scmp.ne.s32.totalorder %s1439_s13, %s1435_s12  ;;  %p108_p4 = scmp.eq.s32.totalorder %s1160_s17, 1 }
   0x8   : > { %s1508_s21 = scalar_select %p89_p1, %s1443_s14, %s91_s19  }
   0x9   : > { %p1510_p5 = por %p102_p2, %p101_p0  ;;  %p1514_p6 = por %p108_p4, %p107_p3 }
   0xa   : > { %p1163_p7 = scmp.ge.s32.totalorder %s1447_s15, 1  ;;  %p140_p8 = scmp.lt.s32.totalorder %s1447_s15, 3 }
   0xc   : > { %p141_p9 = pnand %p1163_p7, %p140_p8 }
   0xe   : > { %144 = sbr.rel (%p141_p9) target bundleno = 1122 (0x462), region = 32 }
  0x13   : > { %p164_p10 = scmp.lt.s32.totalorder %s1493_s16, 1  ;;  %v1449_v0 = vmov 0.0   ;;  %v173_v1 = vld [vmem:[%s1909_s2] sm:$0xff]  ;;  %v1450_v2 = vmov 0   ;;  %v174_v3 = vld [vmem:[%s1909_s2 + $0x8] sm:$0xff]  ;;  %vm203_vm0 = vcmask 1043456  }
  0x14   : > { %272 = vmatprep.mubr.f32.mxu0 %v1449_v0  ;;  %516 = vmatprep.mubr.f32.mxu1 %v1449_v0  ;;  %v170_v6 = vld [vmem:[%s1908_s1] sm:$0xff]  ;;  %vm193_vm1 = vcmask 31744   ;;  %v171_v7 = vld [vmem:[%s1908_s1 + $0x8] sm:$0xff]  ;;  %vm355_vm2 = vcmask 64512   ;;  %v172_v53 = vld [vmem:[%s1908_s1 + $0x10] sm:$0xff]  ;;  %s161_s20 = sand.u32 1, %s1439_s13  }
  0x15   : > { %s165_s26 = scalar_select %p164_p10, %s1493_s16, 1  ;;  %1252 = vset.pattern.permute.xlu0 %v1450_v2 }
  0x16   : > { %178 = vperm.xlu0 %1252, %v173_v1   ;;  %s1164_s24 = sshll.u32 %s161_s20, 3  ;;  %s1210_s25 = sshll.u32 %s1493_s16, 7 }
  0x17   : > { %s1209_s27 = sshll.u32 %s165_s26, 3  ;;  %s163_s26 = scalar_lea.vmem [#allocation2], %s1164_s24 }
  0x18   : > { %s1533_s5 = scalar_lea.vmem %s1907_s0, %s1209_s27  ;;  %s1101_s27 = sshll.u32 %s163_s26, 4  ;;  %s1102_s27 = int_to_ptr.vmem [resolvable:$true] %s1101_s27 }
  0x19   : > { %v169_v4 = vld [vmem:[%s1533_s5] sm:$0xff]  ;;  %s1099_s30 = scalar_lea.hbm %s1910_s3, %s1210_s25  ;;  %s1087_s4 = scalar_lea.sflag [#allocation3], %s161_s20 }
  0x1a   : > { %v192_v5 = vcombine.high %v169_v4, %v169_v4  ;;  %183 = vperm.xlu0 %1252, %v174_v3   ;;  %s1387_s6 = scalar_lea.vmem %s1102_s27, 128  ;;  %s1451_s7 = smov [#allocation2]  }
  0x1b   : > { %p1388_p11 = scmp.ne.s32.totalorder %s1102_s27, %s1387_s6  ;;  %s1391_s8 = sshll.u32 %s1451_s7, 4  ;;  %s1392_s8 = int_to_ptr.vmem [resolvable:$false] %s1391_s8 }
  0x1c   : > { %1167 = vmatprep.subr.msk.mxu0 %vm203_vm0, %v192_v5  ;;  %s1393_s16 = scalar_lea.vmem %s1392_s8, 256  ;;  %p1394_p0 = scmp.lt.s32.totalorder %s1102_s27, %s1392_s8 }
  0x1d   : > { %1168 = vmatpush1.msk.msra.mxu0 %vm203_vm0, %v169_v4  ;;  %p1389_p12 = pnand %p1388_p11, %p1510_p5  ;;  %p1395_p1 = scmp.lt.s32.totalorder %s1393_s16, %s1387_s6 }
  0x1e   : > { %1169 = vmatmul.mubr.msk.f32.vlgmr.msra.gmra.mxu0 %vm193_vm1, %v170_v6 }
  0x1f   : > { %278 = vmatprep.mubr.f32.mxu0 %v1449_v0  ;;  %p1390_p13 = pneg %p1389_p12  ;;  %p1396_p2 = por %p1395_p1, %p1394_p0 }
  0x21   : > { %p1397_p3 = pnand %p1396_p2, %p1390_p13 }
  0x22   : > { %1170 = vmatmul.mubr.msk.f32.gmra.mxu0 %vm193_vm1, %v171_v7 }
  0x23   : > { %284 = vmatprep.mubr.f32.mxu0 %v1449_v0 }
  0x26   : > { %1171 = vmatmul.mubr.msk.f32.gmra.mxu0 %vm193_vm1, %v172_v53 }
  0x91   : > { %v179_v8 = vpop.permute.xlu0 %178 }
  0x95   : > { %v184_v13 = vpop.permute.xlu0 %183 }
  0xde   : > { %v274_v9 = vpop.f32.mrf.mxu0 }
  0xdf   : > { %v275_v10 = vadd.f32 %v274_v9, %v179_v8 }
  0xe0   : > { %v276_v11 = vpop.f32.mrf.mxu0 }
  0xe1   : > { %291 = vxpose.xlu1.b32.start.end [1/1] (short) %v275_v10, 128  ;;  %v277_v17 = vadd.f32 %v276_v11, %v179_v8 }
  0xe2   : > { %v280_v12 = vpop.f32.mrf.mxu0 }
  0xe3   : > { %v281_v16 = vadd.f32 %v280_v12, %v184_v13 }
  0xe4   : > { %v282_v14 = vpop.f32.mrf.mxu0 }
  0xe5   : > { %v283_v15 = vadd.f32 %v282_v14, %v184_v13 }
  0xe7   : > { %482 = vmatprep.subr.mxu1 %v283_v15 }
  0xe8   : > { %483 = vmatpush1.msra.mxu1 %v281_v16 }
 0x11e   : > { %323 = vxpose.xlu1.b32.start.end [1/1] (short) %v277_v17, 128 }
 0x15d   : > { %v307_v18 = vpop.trf.xlu1 }
 0x15e   : > { %1172 = vmatmul.mubr.msk.f32.vlgmr.msra.gmra.mxu1 %vm355_vm2, %v307_v18 }
 0x15f   : > { %522 = vmatprep.mubr.f32.mxu1 %v1449_v0 }
 0x161   : > { %v308_v19 = vpop.trf.xlu1 }
 0x162   : > { %1173 = vmatmul.mubr.msk.f32.gmra.mxu1 %vm355_vm2, %v308_v19 }
 0x163   : > { %528 = vmatprep.mubr.f32.mxu1 %v1449_v0 }
 0x165   : > { %v309_v20 = vpop.trf.xlu1 }
 0x166   : > { %1174 = vmatmul.mubr.msk.f32.gmra.mxu1 %vm355_vm2, %v309_v20 }
 0x167   : > { %534 = vmatprep.mubr.f32.mxu1 %v1449_v0 }
 0x169   : > { %v310_v21 = vpop.trf.xlu1 }
 0x16a   : > { %1175 = vmatmul.mubr.msk.f32.gmra.mxu1 %vm355_vm2, %v310_v21 }
 0x16b   : > { %540 = vmatprep.mubr.f32.mxu1 %v1449_v0 }
 0x16d   : > { %v311_v22 = vpop.trf.xlu1 }
 0x16e   : > { %1176 = vmatmul.mubr.msk.f32.gmra.mxu1 %vm355_vm2, %v311_v22 }
 0x16f   : > { %546 = vmatprep.mubr.f32.mxu1 %v1449_v0 }
 0x171   : > { %v312_v23 = vpop.trf.xlu1 }
 0x172   : > { %1177 = vmatmul.mubr.msk.f32.gmra.mxu1 %vm355_vm2, %v312_v23 }
 0x173   : > { %552 = vmatprep.mubr.f32.mxu1 %v1449_v0 }
 0x175   : > { %v313_v24 = vpop.trf.xlu1 }
 0x176   : > { %1178 = vmatmul.mubr.msk.f32.gmra.mxu1 %vm355_vm2, %v313_v24 }
 0x177   : > { %558 = vmatprep.mubr.f32.mxu1 %v1449_v0 }
 0x179   : > { %v314_v25 = vpop.trf.xlu1 }
 0x17a   : > { %1179 = vmatmul.mubr.msk.f32.gmra.mxu1 %vm355_vm2, %v314_v25 }
 0x17b   : > { %564 = vmatprep.mubr.f32.mxu1 %v1449_v0 }
 0x17d   : > { %v315_v26 = vpop.trf.xlu1 }
 0x17e   : > { %1180 = vmatmul.mubr.msk.f32.gmra.mxu1 %vm355_vm2, %v315_v26 }
 0x17f   : > { %570 = vmatprep.mubr.f32.mxu1 %v1449_v0 }
 0x181   : > { %v316_v27 = vpop.trf.xlu1 }
 0x182   : > { %1181 = vmatmul.mubr.msk.f32.gmra.mxu1 %vm355_vm2, %v316_v27 }
 0x183   : > { %576 = vmatprep.mubr.f32.mxu1 %v1449_v0 }
 0x185   : > { %v317_v28 = vpop.trf.xlu1 }
 0x186   : > { %1182 = vmatmul.mubr.msk.f32.gmra.mxu1 %vm355_vm2, %v317_v28 }
 0x187   : > { %582 = vmatprep.mubr.f32.mxu1 %v1449_v0 }
 0x189   : > { %v318_v29 = vpop.trf.xlu1 }
 0x18a   : > { %1183 = vmatmul.mubr.msk.f32.gmra.mxu1 %vm355_vm2, %v318_v29 }
 0x18b   : > { %588 = vmatprep.mubr.f32.mxu1 %v1449_v0 }
 0x18d   : > { %v319_v30 = vpop.trf.xlu1 }
 0x18e   : > { %1184 = vmatmul.mubr.msk.f32.gmra.mxu1 %vm355_vm2, %v319_v30 }
 0x18f   : > { %594 = vmatprep.mubr.f32.mxu1 %v1449_v0 }
 0x191   : > { %v320_v31 = vpop.trf.xlu1 }
 0x192   : > { %1185 = vmatmul.mubr.msk.f32.gmra.mxu1 %vm355_vm2, %v320_v31 }
 0x193   : > { %600 = vmatprep.mubr.f32.mxu1 %v1449_v0 }
 0x195   : > { %v321_v32 = vpop.trf.xlu1 }
 0x196   : > { %1186 = vmatmul.mubr.msk.f32.gmra.mxu1 %vm355_vm2, %v321_v32 }
 0x197   : > { %606 = vmatprep.mubr.f32.mxu1 %v1449_v0 }
 0x199   : > { %v322_v33 = vpop.trf.xlu1 }
 0x19a   : > { %1187 = vmatmul.mubr.msk.f32.gmra.mxu1 %vm355_vm2, %v322_v33 }
 0x19b   : > { %612 = vmatprep.mubr.f32.mxu1 %v1449_v0 }
 0x19d   : > { %v339_v34 = vpop.trf.xlu1 }
 0x19e   : > { %1188 = vmatmul.mubr.msk.f32.gmra.mxu1 %vm355_vm2, %v339_v34 }
 0x19f   : > { %618 = vmatprep.mubr.f32.mxu1 %v1449_v0 }
 0x1a1   : > { %v340_v35 = vpop.trf.xlu1 }
 0x1a2   : > { %1189 = vmatmul.mubr.msk.f32.gmra.mxu1 %vm355_vm2, %v340_v35 }
 0x1a3   : > { %624 = vmatprep.mubr.f32.mxu1 %v1449_v0 }
 0x1a5   : > { %v341_v36 = vpop.trf.xlu1 }
 0x1a6   : > { %1190 = vmatmul.mubr.msk.f32.gmra.mxu1 %vm355_vm2, %v341_v36 }
 0x1a7   : > { %630 = vmatprep.mubr.f32.mxu1 %v1449_v0 }
 0x1a9   : > { %v342_v37 = vpop.trf.xlu1 }
 0x1aa   : > { %1191 = vmatmul.mubr.msk.f32.gmra.mxu1 %vm355_vm2, %v342_v37 }
 0x1ab   : > { %636 = vmatprep.mubr.f32.mxu1 %v1449_v0 }
 0x1ad   : > { %v343_v38 = vpop.trf.xlu1 }
 0x1ae   : > { %1192 = vmatmul.mubr.msk.f32.gmra.mxu1 %vm355_vm2, %v343_v38 }
 0x1af   : > { %642 = vmatprep.mubr.f32.mxu1 %v1449_v0 }
 0x1b1   : > { %v344_v39 = vpop.trf.xlu1 }
 0x1b2   : > { %1193 = vmatmul.mubr.msk.f32.gmra.mxu1 %vm355_vm2, %v344_v39 }
 0x1b3   : > { %648 = vmatprep.mubr.f32.mxu1 %v1449_v0 }
 0x1b5   : > { %v345_v40 = vpop.trf.xlu1 }
 0x1b6   : > { %1194 = vmatmul.mubr.msk.f32.gmra.mxu1 %vm355_vm2, %v345_v40 }
 0x1b7   : > { %654 = vmatprep.mubr.f32.mxu1 %v1449_v0 }
 0x1b9   : > { %v346_v41 = vpop.trf.xlu1 }
 0x1ba   : > { %1195 = vmatmul.mubr.msk.f32.gmra.mxu1 %vm355_vm2, %v346_v41 }
 0x1bb   : > { %660 = vmatprep.mubr.f32.mxu1 %v1449_v0 }
 0x1bd   : > { %v347_v42 = vpop.trf.xlu1 }
 0x1be   : > { %1196 = vmatmul.mubr.msk.f32.gmra.mxu1 %vm355_vm2, %v347_v42 }
 0x1bf   : > { %666 = vmatprep.mubr.f32.mxu1 %v1449_v0 }
 0x1c1   : > { %v348_v43 = vpop.trf.xlu1 }
 0x1c2   : > { %1197 = vmatmul.mubr.msk.f32.gmra.mxu1 %vm355_vm2, %v348_v43 }
 0x1c3   : > { %672 = vmatprep.mubr.f32.mxu1 %v1449_v0 }
 0x1c5   : > { %v349_v44 = vpop.trf.xlu1 }
 0x1c6   : > { %1198 = vmatmul.mubr.msk.f32.gmra.mxu1 %vm355_vm2, %v349_v44 }
 0x1c7   : > { %678 = vmatprep.mubr.f32.mxu1 %v1449_v0 }
 0x1c9   : > { %v350_v45 = vpop.trf.xlu1 }
 0x1ca   : > { %1199 = vmatmul.mubr.msk.f32.gmra.mxu1 %vm355_vm2, %v350_v45 }
 0x1cb   : > { %684 = vmatprep.mubr.f32.mxu1 %v1449_v0 }
 0x1cd   : > { %v351_v46 = vpop.trf.xlu1 }
 0x1ce   : > { %1200 = vmatmul.mubr.msk.f32.gmra.mxu1 %vm355_vm2, %v351_v46 }
 0x1cf   : > { %690 = vmatprep.mubr.f32.mxu1 %v1449_v0 }
 0x1d1   : > { %v352_v47 = vpop.trf.xlu1 }
 0x1d2   : > { %1201 = vmatmul.mubr.msk.f32.gmra.mxu1 %vm355_vm2, %v352_v47 }
 0x1d3   : > { %696 = vmatprep.mubr.f32.mxu1 %v1449_v0 }
 0x1d5   : > { %v353_v48 = vpop.trf.xlu1 }
 0x1d6   : > { %1202 = vmatmul.mubr.msk.f32.gmra.mxu1 %vm355_vm2, %v353_v48 }
 0x1d7   : > { %702 = vmatprep.mubr.f32.mxu1 %v1449_v0 }
 0x1d9   : > { %v354_v49 = vpop.trf.xlu1 }
 0x1da   : > { %1203 = vmatmul.mubr.msk.f32.gmra.mxu1 %vm355_vm2, %v354_v49 }
 0x21e   : > { %v1609_v50 = vpop.f32.mrf.mxu1 }
 0x21f   : > { %1925 = vst [vmem:[#allocation5_spill] sm:$0xff] %v1609_v50 }
 0x220   : > { %v1611_v51 = vpop.f32.mrf.mxu1 }
 0x222   : > { %v1613_v52 = vpop.f32.mrf.mxu1 }
 0x223   : > { %1926 = vst [vmem:[#allocation6_spill] sm:$0xff] %v1613_v52 }
 0x224   : > { %v1618_v54 = vpop.f32.mrf.mxu1 }
 0x226   : > { %v1621_v55 = vpop.f32.mrf.mxu1 }
 0x227   : > { %1927 = vst [vmem:[#allocation7_spill] sm:$0xff] %v1621_v55 }
 0x228   : > { %v1623_v56 = vpop.f32.mrf.mxu1 }
 0x229   : > { %1928 = vst [vmem:[#allocation8_spill] sm:$0xff] %v1623_v56 }
 0x22a   : > { %v1625_v57 = vpop.f32.mrf.mxu1 }
 0x22c   : > { %v1627_v58 = vpop.f32.mrf.mxu1 }
 0x22e   : > { %v1629_v59 = vpop.f32.mrf.mxu1 }
 0x230   : > { %v1631_v60 = vpop.f32.mrf.mxu1 }
 0x231   : > { %v721_v53 = vmax.f32 %v1629_v59, %v1631_v60 }
 0x232   : > { %v1633_v61 = vpop.f32.mrf.mxu1 }
 0x234   : > { %v1635_v62 = vpop.f32.mrf.mxu1 }
 0x235   : > { %v724_v47 = vmax.f32 %v1633_v61, %v1635_v62 }
 0x236   : > { %v1637_v63 = vpop.f32.mrf.mxu1 }
 0x238   : > { %v1639_v0 = vpop.f32.mrf.mxu1 }
 0x239   : > { %v727_v44 = vmax.f32 %v1637_v63, %v1639_v0 }
 0x23a   : > { %v1641_v1 = vpop.f32.mrf.mxu1 }
 0x23c   : > { %v1643_v2 = vpop.f32.mrf.mxu1 }
 0x23d   : > { %v730_v3 = vmax.f32 %v1641_v1, %v1643_v2 }
 0x23e   : > { %v1647_v4 = vpop.f32.mrf.mxu1 }
 0x23f   : > { %731 = vmax.xlane.f32.xlu1 %v730_v3 }
 0x240   : > { %v1649_v5 = vpop.f32.mrf.mxu1 }
 0x241   : > { %v733_v41 = vmax.f32 %v1647_v4, %v1649_v5 }
 0x242   : > { %v1651_v6 = vpop.f32.mrf.mxu1 }
 0x244   : > { %v1653_v7 = vpop.f32.mrf.mxu1 }
 0x245   : > { %v736_v38 = vmax.f32 %v1651_v6, %v1653_v7 }
 0x246   : > { %v1655_v8 = vpop.f32.mrf.mxu1 }
 0x248   : > { %v1657_v9 = vpop.f32.mrf.mxu1 }
 0x249   : > { %v739_v35 = vmax.f32 %v1655_v8, %v1657_v9 }
 0x24a   : > { %v1659_v10 = vpop.f32.mrf.mxu1 }
 0x24c   : > { %v1661_v11 = vpop.f32.mrf.mxu1 }
 0x24d   : > { %v742_v32 = vmax.f32 %v1659_v10, %v1661_v11 }
 0x24e   : > { %v1663_v12 = vpop.f32.mrf.mxu1 }
 0x250   : > { %v1665_v13 = vpop.f32.mrf.mxu1 }
 0x251   : > { %v745_v29 = vmax.f32 %v1663_v12, %v1665_v13 }
 0x252   : > { %v1667_v14 = vpop.f32.mrf.mxu1 }
 0x254   : > { %v1669_v15 = vpop.f32.mrf.mxu1 }
 0x255   : > { %v748_v26 = vmax.f32 %v1667_v14, %v1669_v15 }
 0x256   : > { %v1671_v16 = vpop.f32.mrf.mxu1 }
 0x258   : > { %v1673_v17 = vpop.f32.mrf.mxu1 }
 0x259   : > { %v751_v23 = vmax.f32 %v1671_v16, %v1673_v17 }
 0x25a   : > { %v1675_v18 = vpop.f32.mrf.mxu1 }
 0x25c   : > { %v1677_v19 = vpop.f32.mrf.mxu1 }
 0x25d   : > { %v754_v20 = vmax.f32 %v1675_v18, %v1677_v19 }
 0x25e   : > { %v1681_v21 = vpop.f32.mrf.mxu1 }
 0x25f   : > { %1929 = vst [vmem:[#allocation9_spill] sm:$0xff] %v1681_v21  ;;  %755 = vmax.xlane.f32.xlu0 %v754_v20 }
 0x260   : > { %v1683_v22 = vpop.f32.mrf.mxu1 }
 0x261   : > { %1930 = vst [vmem:[#allocation10_spill] sm:$0xff] %v1683_v22 }
 0x262   : > { %v1687_v24 = vpop.f32.mrf.mxu1 }
 0x263   : > { %1931 = vst [vmem:[#allocation11_spill] sm:$0xff] %v1687_v24  ;;  %752 = vmax.xlane.f32.xlu0 %v751_v23  ;;  %v718_v23 = vmax.f32 %v1625_v57, %v1627_v58 }
 0x264   : > { %v1689_v25 = vpop.f32.mrf.mxu1 }
 0x266   : > { %v1693_v27 = vpop.f32.mrf.mxu1 }
 0x267   : > { %1932 = vst [vmem:[#allocation12_spill] sm:$0xff] %v1693_v27  ;;  %749 = vmax.xlane.f32.xlu0 %v748_v26 }
 0x268   : > { %v1695_v28 = vpop.f32.mrf.mxu1 }
 0x26a   : > { %v1699_v30 = vpop.f32.mrf.mxu1 }
 0x26b   : > { %1933 = vst [vmem:[#allocation13_spill] sm:$0xff] %v1699_v30  ;;  %746 = vmax.xlane.f32.xlu0 %v745_v29 }
 0x26c   : > { %v1701_v31 = vpop.f32.mrf.mxu1 }
 0x26e   : > { %v1705_v33 = vpop.f32.mrf.mxu1 }
 0x26f   : > { %1934 = vst [vmem:[#allocation14_spill] sm:$0xff] %v1705_v33  ;;  %743 = vmax.xlane.f32.xlu0 %v742_v32  ;;  %v715_v32 = vmax.f32 %v1621_v55, %v1623_v56 }
 0x270   : > { %v1707_v34 = vpop.f32.mrf.mxu1 }
 0x272   : > { %v1711_v36 = vpop.f32.mrf.mxu1 }
 0x273   : > { %740 = vmax.xlane.f32.xlu0 %v739_v35 }
 0x274   : > { %v1713_v37 = vpop.f32.mrf.mxu1 }
 0x276   : > { %v1717_v39 = vpop.f32.mrf.mxu1 }
 0x277   : > { %737 = vmax.xlane.f32.xlu0 %v736_v38 }
 0x278   : > { %v1719_v40 = vpop.f32.mrf.mxu1 }
 0x27a   : > { %v1723_v42 = vpop.f32.mrf.mxu1 }
 0x27b   : > { %734 = vmax.xlane.f32.xlu0 %v733_v41  ;;  %v712_v41 = vmax.f32 %v1613_v52, %v1618_v54 }
 0x27c   : > { %v1725_v43 = vpop.f32.mrf.mxu1 }
 0x27e   : > { %v1729_v45 = vpop.f32.mrf.mxu1 }
 0x27f   : > { %728 = vmax.xlane.f32.xlu0 %v727_v44 }
 0x280   : > { %v1731_v46 = vpop.f32.mrf.mxu1 }
 0x282   : > { %v1735_v48 = vpop.f32.mrf.mxu1 }
 0x283   : > { %725 = vmax.xlane.f32.xlu0 %v724_v47 }
 0x284   : > { %v1737_v49 = vpop.f32.mrf.mxu1 }
 0x286   : > { %v1741_v3 = vpop.f32.mrf.mxu1 }
 0x287   : > { %722 = vmax.xlane.f32.xlu0 %v721_v53  ;;  %v709_v53 = vmax.f32 %v1609_v50, %v1611_v51 }
 0x288   : > { %v1743_v20 = vpop.f32.mrf.mxu1 }
 0x28a   : > { %v1747_v26 = vpop.f32.mrf.mxu1 }
 0x28b   : > { %719 = vmax.xlane.f32.xlu0 %v718_v23 }
 0x28c   : > { %v1749_v29 = vpop.f32.mrf.mxu1 }
 0x28e   : > { %v1753_v35 = vpop.f32.mrf.mxu1 }
 0x28f   : > { %716 = vmax.xlane.f32.xlu0 %v715_v32 }
 0x290   : > { %v1755_v38 = vpop.f32.mrf.mxu1 }
 0x292   : > { %v1759_v44 = vpop.f32.mrf.mxu1 }
 0x293   : > { %713 = vmax.xlane.f32.xlu0 %v712_v41 }
 0x294   : > { %v1761_v47 = vpop.f32.mrf.mxu1 }
 0x295   : > { %v796_v50 = vmax.f32 %v1759_v44, %v1761_v47 }
 0x296   : > { %v1765_v23 = vpop.f32.mrf.mxu1 }
 0x297   : > { %1935 = vst [vmem:[#allocation15_spill] sm:$0xff] %v1765_v23  ;;  %710 = vmax.xlane.f32.xlu0 %v709_v53  ;;  %v793_v53 = vmax.f32 %v1753_v35, %v1755_v38 }
 0x298   : > { %v1767_v55 = vpop.f32.mrf.mxu1 }
 0x299   : > { %v799_v32 = vmax.f32 %v1765_v23, %v1767_v55  ;;  %v790_v23 = vmax.f32 %v1747_v26, %v1749_v29 }
 0x29a   : > { %v1771_v56 = vpop.f32.mrf.mxu1 }
 0x29b   : > { %800 = vmax.xlane.f32.xlu0 %v799_v32  ;;  %v787_v32 = vmax.f32 %v1741_v3, %v1743_v20 }
 0x29c   : > { %v1773_v52 = vpop.f32.mrf.mxu1 }
 0x29d   : > { %1936 = vst [vmem:[#allocation16_spill] sm:$0xff] %v1773_v52  ;;  %v802_v41 = vmax.f32 %v1771_v56, %v1773_v52  ;;  %v784_v52 = vmax.f32 %v1735_v48, %v1737_v49 }
 0x29f   : > { %803 = vmax.xlane.f32.xlu0 %v802_v41  ;;  %v781_v41 = vmax.f32 %v1729_v45, %v1731_v46 }
 0x2a3   : > { %797 = vmax.xlane.f32.xlu0 %v796_v50  ;;  %v778_v50 = vmax.f32 %v1723_v42, %v1725_v43 }
 0x2a7   : > { %794 = vmax.xlane.f32.xlu0 %v793_v53  ;;  %v775_v53 = vmax.f32 %v1717_v39, %v1719_v40 }
 0x2ab   : > { %791 = vmax.xlane.f32.xlu0 %v790_v23  ;;  %v772_v23 = vmax.f32 %v1711_v36, %v1713_v37 }
 0x2af   : > { %788 = vmax.xlane.f32.xlu0 %v787_v32  ;;  %v769_v32 = vmax.f32 %v1705_v33, %v1707_v34 }
 0x2b3   : > { %785 = vmax.xlane.f32.xlu0 %v784_v52  ;;  %v766_v52 = vmax.f32 %v1699_v30, %v1701_v31 }
 0x2b7   : > { %782 = vmax.xlane.f32.xlu0 %v781_v41  ;;  %v763_v41 = vmax.f32 %v1693_v27, %v1695_v28 }
 0x2bb   : > { %779 = vmax.xlane.f32.xlu0 %v778_v50  ;;  %v760_v50 = vmax.f32 %v1687_v24, %v1689_v25 }
 0x2bf   : > { %776 = vmax.xlane.f32.xlu0 %v775_v53  ;;  %v757_v53 = vmax.f32 %v1681_v21, %v1683_v22 }
 0x2c3   : > { %773 = vmax.xlane.f32.xlu0 %v772_v23 }
 0x2c7   : > { %770 = vmax.xlane.f32.xlu0 %v769_v32 }
 0x2cb   : > { %767 = vmax.xlane.f32.xlu0 %v766_v52  ;;  %v175_v52 = vld [vmem:[%s1909_s2 + $0x10] sm:$0xff] }
 0x2cf   : > { %764 = vmax.xlane.f32.xlu0 %v763_v41 }
 0x2d3   : > { %761 = vmax.xlane.f32.xlu0 %v760_v50 }
 0x2d7   : > { %758 = vmax.xlane.f32.xlu0 %v757_v53 }
 0x2e8   : > { %v756_v23 = vpop.xlane.xlu0 %755 }
 0x2e9   : > { %v835_v33 = vsub.f32 %v1675_v18, %v756_v23  ;;  %v836_v32 = vsub.f32 %v1677_v19, %v756_v23 }
 0x2eb   : > { %v929_v30 = vmul.f32 1.442695, %v835_v33  ;;  %v931_v27 = vmul.f32 1.442695, %v836_v32 }
 0x2ec   : > { %v753_v41 = vpop.xlane.xlu0 %752 }
 0x2ed   : > { %1254 = vpow2.f32 %v929_v30  ;;  %v833_v24 = vsub.f32 %v1671_v16, %v753_v41  ;;  %v834_v50 = vsub.f32 %v1673_v17, %v753_v41  ;;  %188 = vperm.xlu0 %1252, %v175_v52  }
 0x2ee   : > { %1256 = vpow2.f32 %v931_v27 }
 0x2ef   : > { %v925_v53 = vmul.f32 1.442695, %v833_v24  ;;  %v927_v21 = vmul.f32 1.442695, %v834_v50 }
 0x2f0   : > { %v750_v22 = vpop.xlane.xlu0 %749 }
 0x2f1   : > { %1258 = vpow2.f32 %v925_v53  ;;  %v831_v18 = vsub.f32 %v1667_v14, %v750_v22  ;;  %v832_v19 = vsub.f32 %v1669_v15, %v750_v22 }
 0x2f2   : > { %1260 = vpow2.f32 %v927_v21 }
 0x2f3   : > { %v921_v23 = vmul.f32 1.442695, %v831_v18  ;;  %v923_v33 = vmul.f32 1.442695, %v832_v19 }
 0x2f4   : > { %v747_v32 = vpop.xlane.xlu0 %746 }
 0x2f5   : > { %1262 = vpow2.f32 %v921_v23  ;;  %v829_v30 = vsub.f32 %v1663_v12, %v747_v32  ;;  %v830_v16 = vsub.f32 %v1665_v13, %v747_v32  ;;  %v732_v23 = vpop.xlane.xlu1 %731 }
 0x2f6   : > { %1264 = vpow2.f32 %v923_v33 }
 0x2f7   : > { %v917_v17 = vmul.f32 1.442695, %v829_v30  ;;  %v919_v27 = vmul.f32 1.442695, %v830_v16 }
 0x2f8   : > { %v744_v24 = vpop.xlane.xlu0 %743 }
 0x2f9   : > { %1266 = vpow2.f32 %v917_v17  ;;  %v827_v52 = vsub.f32 %v1659_v10, %v744_v24  ;;  %v828_v14 = vsub.f32 %v1661_v11, %v744_v24 }
 0x2fa   : > { %v1255_v41 = vpop.eup %1254  ;;  %1268 = vpow2.f32 %v919_v27 }
 0x2fb   : > { %v1257_v15 = vpop.eup %1256  ;;  %v913_v21 = vmul.f32 1.442695, %v827_v52  ;;  %v915_v22 = vmul.f32 1.442695, %v828_v14 }
 0x2fc   : > { %997 = vmatprep.subr.mxu0 %v1257_v15  ;;  %v741_v50 = vpop.xlane.xlu0 %740 }
 0x2fd   : > { %1270 = vpow2.f32 %v913_v21  ;;  %998 = vmatpush1.xpose.msra.mxu0 %v1255_v41  ;;  %v825_v12 = vsub.f32 %v1655_v8, %v741_v50  ;;  %v826_v13 = vsub.f32 %v1657_v9, %v741_v50  ;;  %v820_v9 = vsub.f32 %v1643_v2, %v732_v23 }
 0x2fe   : > { %v1259_v53 = vpop.eup %1258  ;;  %1272 = vpow2.f32 %v915_v22 }
 0x2ff   : > { %v1261_v18 = vpop.eup %1260  ;;  %v909_v19 = vmul.f32 1.442695, %v825_v12  ;;  %v911_v10 = vmul.f32 1.442695, %v826_v13  ;;  %v899_v21 = vmul.f32 1.442695, %v820_v9 }
 0x300   : > { %999 = vmatprep.subr.mxu0 %v1261_v18  ;;  %v738_v11 = vpop.xlane.xlu0 %737 }
 0x301   : > { %1274 = vpow2.f32 %v909_v19  ;;  %1000 = vmatpush1.xpose.msra.mxu0 %v1259_v53  ;;  %v823_v33 = vsub.f32 %v1651_v6, %v738_v11  ;;  %v824_v32 = vsub.f32 %v1653_v7, %v738_v11  ;;  %v819_v7 = vsub.f32 %v1641_v1, %v732_v23 }
 0x302   : > { %v1263_v30 = vpop.eup %1262  ;;  %1276 = vpow2.f32 %v911_v10 }
 0x303   : > { %v1265_v16 = vpop.eup %1264  ;;  %v905_v8 = vmul.f32 1.442695, %v823_v33  ;;  %v907_v17 = vmul.f32 1.442695, %v824_v32 }
 0x304   : > { %1001 = vmatprep.subr.mxu0 %v1265_v16  ;;  %v735_v27 = vpop.xlane.xlu0 %734 }
 0x305   : > { %1278 = vpow2.f32 %v905_v8  ;;  %1002 = vmatpush1.xpose.msra.mxu0 %v1263_v30  ;;  %v821_v24 = vsub.f32 %v1647_v4, %v735_v27  ;;  %v822_v52 = vsub.f32 %v1649_v5, %v735_v27  ;;  %v897_v4 = vmul.f32 1.442695, %v819_v7 }
 0x306   : > { %v1267_v14 = vpop.eup %1266  ;;  %1280 = vpow2.f32 %v907_v17 }
 0x307   : > { %v1269_v6 = vpop.eup %1268  ;;  %v901_v41 = vmul.f32 1.442695, %v821_v24  ;;  %v903_v15 = vmul.f32 1.442695, %v822_v52 }
 0x308   : > { %1003 = vmatprep.subr.mxu0 %v1269_v6  ;;  %v729_v22 = vpop.xlane.xlu0 %728 }
 0x309   : > { %1282 = vpow2.f32 %v901_v41  ;;  %1004 = vmatpush1.xpose.msra.mxu0 %v1267_v14  ;;  %v818_v2 = vsub.f32 %v1639_v0, %v729_v22  ;;  %v817_v5 = vsub.f32 %v1637_v63, %v729_v22  ;;  %v1938_v41 = vld [vmem:[#allocation7_spill] sm:$0xff] }
 0x30a   : > { %v1271_v50 = vpop.eup %1270  ;;  %1284 = vpow2.f32 %v903_v15 }
 0x30b   : > { %v1273_v12 = vpop.eup %1272  ;;  %1286 = vpow2.f32 %v899_v21  ;;  %v895_v13 = vmul.f32 1.442695, %v818_v2  ;;  %v893_v10 = vmul.f32 1.442695, %v817_v5 }
 0x30c   : > { %1005 = vmatprep.subr.mxu0 %v1273_v12  ;;  %v726_v53 = vpop.xlane.xlu0 %725  ;;  %1288 = vpow2.f32 %v897_v4  ;;  %v1939_v12 = vld [vmem:[#allocation6_spill] sm:$0xff] }
 0x30d   : > { %1006 = vmatpush1.xpose.msra.mxu0 %v1271_v50  ;;  %v816_v1 = vsub.f32 %v1635_v62, %v726_v53  ;;  %v815_v11 = vsub.f32 %v1633_v61, %v726_v53  ;;  %1290 = vpow2.f32 %v895_v13 }
 0x30e   : > { %v1275_v18 = vpop.eup %1274  ;;  %1292 = vpow2.f32 %v893_v10  ;;  %v1940_v10 = vld [vmem:[#allocation5_spill] sm:$0xff] }
 0x30f   : > { %v1277_v19 = vpop.eup %1276  ;;  %v891_v0 = vmul.f32 1.442695, %v816_v1  ;;  %v889_v30 = vmul.f32 1.442695, %v815_v11 }
 0x310   : > { %1007 = vmatprep.subr.mxu0 %v1277_v19  ;;  %v723_v23 = vpop.xlane.xlu0 %722 }
 0x311   : > { %1008 = vmatpush1.xpose.msra.mxu0 %v1275_v18  ;;  %v814_v63 = vsub.f32 %v1631_v60, %v723_v23  ;;  %v813_v16 = vsub.f32 %v1629_v59, %v723_v23  ;;  %1294 = vpow2.f32 %v891_v0  ;;  %v1937_v59 = vld [vmem:[#allocation8_spill] sm:$0xff] }
 0x312   : > { %v1279_v33 = vpop.eup %1278  ;;  %1296 = vpow2.f32 %v889_v30 }
 0x313   : > { %v1281_v32 = vpop.eup %1280  ;;  %v887_v62 = vmul.f32 1.442695, %v814_v63  ;;  %v885_v27 = vmul.f32 1.442695, %v813_v16 }
 0x314   : > { %1009 = vmatprep.subr.mxu0 %v1281_v32  ;;  %v720_v8 = vpop.xlane.xlu0 %719 }
 0x315   : > { %1010 = vmatpush1.xpose.msra.mxu0 %v1279_v33  ;;  %v812_v61 = vsub.f32 %v1627_v58, %v720_v8  ;;  %v811_v24 = vsub.f32 %v1625_v57, %v720_v8  ;;  %1298 = vpow2.f32 %v887_v62  ;;  %v1941_v8 = vld [vmem:[#allocation16_spill] sm:$0xff] }
 0x316   : > { %v1283_v17 = vpop.eup %1282  ;;  %1300 = vpow2.f32 %v885_v27 }
 0x317   : > { %v1285_v9 = vpop.eup %1284  ;;  %v883_v60 = vmul.f32 1.442695, %v812_v61  ;;  %v881_v7 = vmul.f32 1.442695, %v811_v24 }
 0x318   : > { %1011 = vmatprep.subr.mxu0 %v1285_v9  ;;  %v717_v52 = vpop.xlane.xlu0 %716  ;;  %v1287_v14 = vpop.eup %1286 }
 0x319   : > { %1012 = vmatpush1.xpose.msra.mxu0 %v1283_v17  ;;  %v810_v6 = vsub.f32 %v1937_v59, %v717_v52  ;;  %v809_v15 = vsub.f32 %v1938_v41, %v717_v52  ;;  %v1289_v58 = vpop.eup %1288  ;;  %1302 = vpow2.f32 %v883_v60  ;;  %v1942_v17 = vld [vmem:[#allocation15_spill] sm:$0xff] }
 0x31a   : > { %1013 = vmatprep.subr.mxu0 %v1287_v14  ;;  %v1291_v2 = vpop.eup %1290  ;;  %1304 = vpow2.f32 %v881_v7 }
 0x31b   : > { %v879_v21 = vmul.f32 1.442695, %v810_v6  ;;  %v877_v50 = vmul.f32 1.442695, %v809_v15  ;;  %v1293_v5 = vpop.eup %1292 }
 0x31c   : > { %v714_v22 = vpop.xlane.xlu0 %713 }
 0x31d   : > { %v808_v57 = vsub.f32 %v1618_v54, %v714_v22  ;;  %1014 = vmatpush1.xpose.msra.mxu0 %v1289_v58  ;;  %v807_v4 = vsub.f32 %v1939_v12, %v714_v22  ;;  %1306 = vpow2.f32 %v879_v21 }
 0x31e   : > { %1015 = vmatprep.subr.mxu0 %v1291_v2  ;;  %v1295_v1 = vpop.eup %1294  ;;  %1308 = vpow2.f32 %v877_v50 }
 0x31f   : > { %v875_v13 = vmul.f32 1.442695, %v808_v57  ;;  %v873_v19 = vmul.f32 1.442695, %v807_v4  ;;  %v1297_v54 = vpop.eup %1296 }
 0x320   : > { %v711_v53 = vpop.xlane.xlu0 %710 }
 0x321   : > { %v806_v18 = vsub.f32 %v1611_v51, %v711_v53  ;;  %1016 = vmatpush1.xpose.msra.mxu0 %v1293_v5  ;;  %v805_v11 = vsub.f32 %v1940_v10, %v711_v53  ;;  %1310 = vpow2.f32 %v875_v13 }
 0x322   : > { %1017 = vmatprep.subr.mxu0 %v1295_v1  ;;  %v1299_v63 = vpop.eup %1298  ;;  %1312 = vpow2.f32 %v873_v19 }
 0x323   : > { %v871_v0 = vmul.f32 1.442695, %v806_v18  ;;  %v869_v33 = vmul.f32 1.442695, %v805_v11  ;;  %v1301_v32 = vpop.eup %1300 }
 0x324   : > { %v801_v23 = vpop.xlane.xlu0 %800 }
 0x325   : > { %1018 = vmatpush1.xpose.msra.mxu0 %v1297_v54  ;;  %1314 = vpow2.f32 %v871_v0  ;;  %v866_v30 = vsub.f32 %v1767_v55, %v801_v23  ;;  %v865_v9 = vsub.f32 %v1942_v17, %v801_v23 }
 0x326   : > { %1019 = vmatprep.subr.mxu0 %v1299_v63  ;;  %v1303_v16 = vpop.eup %1302  ;;  %1316 = vpow2.f32 %v869_v33 }
 0x327   : > { %v1305_v60 = vpop.eup %1304  ;;  %v991_v52 = vmul.f32 1.442695, %v866_v30 }
 0x328   : > { %v804_v51 = vpop.xlane.xlu0 %803 }
 0x329   : > { %v867_v62 = vsub.f32 %v1771_v56, %v804_v51  ;;  %v868_v61 = vsub.f32 %v1941_v8, %v804_v51  ;;  %1020 = vmatpush1.xpose.msra.mxu0 %v1301_v32  ;;  %v989_v56 = vmul.f32 1.442695, %v865_v9 }
 0x32a   : > { %1021 = vmatprep.subr.mxu0 %v1303_v16  ;;  %v1307_v59 = vpop.eup %1306 }
 0x32b   : > { %v993_v27 = vmul.f32 1.442695, %v867_v62  ;;  %v995_v24 = vmul.f32 1.442695, %v868_v61  ;;  %v1309_v7 = vpop.eup %1308 }
 0x32c   : > { %v798_v14 = vpop.xlane.xlu0 %797 }
 0x32d   : > { %1318 = vpow2.f32 %v993_v27  ;;  %v864_v55 = vsub.f32 %v1761_v47, %v798_v14  ;;  %1022 = vmatpush1.xpose.msra.mxu0 %v1305_v60  ;;  %v863_v6 = vsub.f32 %v1759_v44, %v798_v14 }
 0x32e   : > { %1320 = vpow2.f32 %v995_v24  ;;  %1023 = vmatprep.subr.mxu0 %v1307_v59  ;;  %v1311_v58 = vpop.eup %1310 }
 0x32f   : > { %1322 = vpow2.f32 %v991_v52  ;;  %v987_v41 = vmul.f32 1.442695, %v864_v55  ;;  %v985_v22 = vmul.f32 1.442695, %v863_v6  ;;  %v1313_v47 = vpop.eup %1312 }
 0x330   : > { %v795_v15 = vpop.xlane.xlu0 %794  ;;  %1324 = vpow2.f32 %v989_v56 }
 0x331   : > { %v862_v21 = vsub.f32 %v1755_v38, %v795_v15  ;;  %1024 = vmatpush1.xpose.msra.mxu0 %v1309_v7  ;;  %v861_v2 = vsub.f32 %v1753_v35, %v795_v15  ;;  %1326 = vpow2.f32 %v987_v41 }
 0x332   : > { %1025 = vmatprep.subr.mxu0 %v1311_v58  ;;  %v1315_v12 = vpop.eup %1314  ;;  %1328 = vpow2.f32 %v985_v22 }
 0x333   : > { %v983_v57 = vmul.f32 1.442695, %v862_v21  ;;  %v981_v4 = vmul.f32 1.442695, %v861_v2  ;;  %v1317_v38 = vpop.eup %1316  ;;  %v1943_v21 = vld [vmem:[#allocation14_spill] sm:$0xff] }
 0x334   : > { %v792_v50 = vpop.xlane.xlu0 %791 }
 0x335   : > { %v860_v44 = vsub.f32 %v1749_v29, %v792_v50  ;;  %1026 = vmatpush1.xpose.msra.mxu0 %v1313_v47  ;;  %v859_v5 = vsub.f32 %v1747_v26, %v792_v50  ;;  %1330 = vpow2.f32 %v983_v57 }
 0x336   : > { %1027 = vmatprep.subr.mxu0 %v1315_v12  ;;  %1332 = vpow2.f32 %v981_v4  ;;  %v1944_v12 = vld [vmem:[#allocation13_spill] sm:$0xff] }
 0x337   : > { %v979_v13 = vmul.f32 1.442695, %v860_v44  ;;  %v977_v19 = vmul.f32 1.442695, %v859_v5 }
 0x338   : > { %v789_v53 = vpop.xlane.xlu0 %788 }
 0x339   : > { %v858_v1 = vsub.f32 %v1743_v20, %v789_v53  ;;  %1028 = vmatpush1.xpose.msra.mxu0 %v1317_v38  ;;  %v857_v10 = vsub.f32 %v1741_v3, %v789_v53  ;;  %1334 = vpow2.f32 %v979_v13 }
 0x33a   : > { %v1319_v35 = vpop.eup %1318  ;;  %1336 = vpow2.f32 %v977_v19 }
 0x33b   : > { %v1321_v18 = vpop.eup %1320  ;;  %v975_v29 = vmul.f32 1.442695, %v858_v1  ;;  %v973_v0 = vmul.f32 1.442695, %v857_v10  ;;  %v1945_v1 = vld [vmem:[#allocation12_spill] sm:$0xff] }
 0x33c   : > { %1029 = vmatprep.subr.mxu0 %v1321_v18  ;;  %v786_v11 = vpop.xlane.xlu0 %785  ;;  %v1323_v54 = vpop.eup %1322 }
 0x33d   : > { %v856_v26 = vsub.f32 %v1737_v49, %v786_v11  ;;  %1030 = vmatpush2.xpose.msra.mxu0 %v1319_v35  ;;  %v855_v20 = vsub.f32 %v1735_v48, %v786_v11  ;;  %v1325_v23 = vpop.eup %1324  ;;  %1338 = vpow2.f32 %v975_v29 }
 0x33e   : > { %1031 = vmatprep.subr.mxu0 %v1323_v54  ;;  %v1327_v32 = vpop.eup %1326  ;;  %1340 = vpow2.f32 %v973_v0  ;;  %v1946_v54 = vld [vmem:[#allocation11_spill] sm:$0xff] }
 0x33f   : > { %v971_v63 = vmul.f32 1.442695, %v856_v26  ;;  %v969_v30 = vmul.f32 1.442695, %v855_v20  ;;  %v1329_v49 = vpop.eup %1328 }
 0x340   : > { %v783_v33 = vpop.xlane.xlu0 %782 }
 0x341   : > { %v854_v3 = vsub.f32 %v1731_v46, %v783_v33  ;;  %1032 = vmatpush2.xpose.msra.mxu0 %v1325_v23  ;;  %v853_v51 = vsub.f32 %v1729_v45, %v783_v33  ;;  %1342 = vpow2.f32 %v971_v63  ;;  %v1947_v63 = vld [vmem:[#allocation10_spill] sm:$0xff] }
 0x342   : > { %1033 = vmatprep.subr.mxu0 %v1327_v32  ;;  %v1331_v8 = vpop.eup %1330  ;;  %1344 = vpow2.f32 %v969_v30  ;;  %v286_v32 = vpop.f32.mrf.mxu0  ;;  %v1948_v30 = vld [vmem:[#allocation9_spill] sm:$0xff] }
 0x343   : > { %v967_v16 = vmul.f32 1.442695, %v854_v3  ;;  %v965_v61 = vmul.f32 1.442695, %v853_v51  ;;  %v1333_v46 = vpop.eup %1332 }
 0x344   : > { %v780_v62 = vpop.xlane.xlu0 %779 }
 0x345   : > { %v852_v48 = vsub.f32 %v1725_v43, %v780_v62  ;;  %1034 = vmatpush2.xpose.msra.mxu0 %v1329_v49  ;;  %v851_v17 = vsub.f32 %v1723_v42, %v780_v62  ;;  %1346 = vpow2.f32 %v967_v16  ;;  %v288_v62 = vpop.f32.mrf.mxu0 }
 0x346   : > { %1035 = vmatprep.subr.mxu0 %v1331_v8  ;;  %v1335_v24 = vpop.eup %1334  ;;  %1348 = vpow2.f32 %v965_v61 }
 0x347   : > { %v963_v9 = vmul.f32 1.442695, %v852_v48  ;;  %v961_v60 = vmul.f32 1.442695, %v851_v17  ;;  %v1337_v43 = vpop.eup %1336 }
 0x348   : > { %v777_v27 = vpop.xlane.xlu0 %776 }
 0x349   : > { %v850_v45 = vsub.f32 %v1719_v40, %v777_v27  ;;  %1036 = vmatpush2.xpose.msra.mxu0 %v1333_v46  ;;  %v849_v52 = vsub.f32 %v1717_v39, %v777_v27  ;;  %1350 = vpow2.f32 %v963_v9 }
 0x34a   : > { %1037 = vmatprep.subr.mxu0 %v1335_v24  ;;  %v1339_v55 = vpop.eup %1338  ;;  %1352 = vpow2.f32 %v961_v60 }
 0x34b   : > { %v959_v14 = vmul.f32 1.442695, %v850_v45  ;;  %v957_v56 = vmul.f32 1.442695, %v849_v52  ;;  %v1341_v40 = vpop.eup %1340 }
 0x34c   : > { %v774_v59 = vpop.xlane.xlu0 %773 }
 0x34d   : > { %v848_v42 = vsub.f32 %v1713_v37, %v774_v59  ;;  %1038 = vmatpush2.xpose.msra.mxu0 %v1337_v43  ;;  %v847_v6 = vsub.f32 %v1711_v36, %v774_v59  ;;  %1354 = vpow2.f32 %v959_v14 }
 0x34e   : > { %1039 = vmatprep.subr.mxu0 %v1339_v55  ;;  %v1343_v15 = vpop.eup %1342  ;;  %1356 = vpow2.f32 %v957_v56 }
 0x34f   : > { %v955_v7 = vmul.f32 1.442695, %v848_v42  ;;  %v953_v58 = vmul.f32 1.442695, %v847_v6  ;;  %v1345_v37 = vpop.eup %1344  ;;  %v1070_v42 = vlaneseq }
 0x350   : > { %v771_v41 = vpop.xlane.xlu0 %770 }
 0x351   : > { %v846_v39 = vsub.f32 %v1707_v34, %v771_v41  ;;  %1040 = vmatpush2.xpose.msra.mxu0 %v1341_v40  ;;  %v845_v22 = vsub.f32 %v1943_v21, %v771_v41  ;;  %1358 = vpow2.f32 %v955_v7  ;;  %v1071_v56 = vshrl.u32 %v1070_v42, 7 }
 0x352   : > { %1041 = vmatprep.subr.mxu0 %v1343_v15  ;;  %v1347_v57 = vpop.eup %1346  ;;  %1360 = vpow2.f32 %v953_v58 }
 0x353   : > { %v951_v2 = vmul.f32 1.442695, %v846_v39  ;;  %v949_v50 = vmul.f32 1.442695, %v845_v22  ;;  %v1349_v34 = vpop.eup %1348  ;;  %v1072_v6 = vsub.s32 4, %v1071_v56  ;;  %v1386_v22 = vld [vmem:[%s1533_s5] sm:$0xff] }
 0x354   : > { %v768_v47 = vpop.xlane.xlu0 %767 }
 0x355   : > { %v844_v36 = vsub.f32 %v1701_v31, %v768_v47  ;;  %1042 = vmatpush2.xpose.msra.mxu0 %v1345_v37  ;;  %v843_v44 = vsub.f32 %v1944_v12, %v768_v47  ;;  %1362 = vpow2.f32 %v951_v2 }
 0x356   : > { %1043 = vmatprep.subr.mxu0 %v1347_v57  ;;  %v1351_v38 = vpop.eup %1350  ;;  %1364 = vpow2.f32 %v949_v50 }
 0x357   : > { %v947_v4 = vmul.f32 1.442695, %v844_v36  ;;  %v945_v53 = vmul.f32 1.442695, %v843_v44  ;;  %v1353_v31 = vpop.eup %1352 }
 0x358   : > { %v765_v5 = vpop.xlane.xlu0 %764 }
 0x359   : > { %v842_v13 = vsub.f32 %v1695_v28, %v765_v5  ;;  %1044 = vmatpush2.xpose.msra.mxu0 %v1349_v34  ;;  %v841_v35 = vsub.f32 %v1945_v1, %v765_v5  ;;  %1366 = vpow2.f32 %v947_v4 }
 0x35a   : > { %1045 = vmatprep.subr.mxu0 %v1351_v38  ;;  %v1355_v10 = vpop.eup %1354  ;;  %1368 = vpow2.f32 %v945_v53 }
 0x35b   : > { %v943_v18 = vmul.f32 1.442695, %v842_v13  ;;  %v941_v11 = vmul.f32 1.442695, %v841_v35  ;;  %v1357_v28 = vpop.eup %1356 }
 0x35c   : > { %v762_v19 = vpop.xlane.xlu0 %761 }
 0x35d   : > { %v840_v29 = vsub.f32 %v1689_v25, %v762_v19  ;;  %1046 = vmatpush2.xpose.msra.mxu0 %v1353_v31  ;;  %v839_v26 = vsub.f32 %v1946_v54, %v762_v19  ;;  %1370 = vpow2.f32 %v943_v18 }
 0x35e   : > { %1047 = vmatprep.subr.mxu0 %v1355_v10  ;;  %v1359_v23 = vpop.eup %1358  ;;  %1372 = vpow2.f32 %v941_v11 }
 0x35f   : > { %v939_v0 = vmul.f32 1.442695, %v840_v29  ;;  %v937_v3 = vmul.f32 1.442695, %v839_v26  ;;  %v1361_v51 = vpop.eup %1360 }
 0x360   : > { %v759_v20 = vpop.xlane.xlu0 %758 }
 0x361   : > { %v838_v33 = vsub.f32 %v1947_v63, %v759_v20  ;;  %1048 = vmatpush2.xpose.msra.mxu0 %v1357_v28  ;;  %v837_v25 = vsub.f32 %v1948_v30, %v759_v20  ;;  %1374 = vpow2.f32 %v939_v0 }
 0x362   : > { %1049 = vmatprep.subr.mxu0 %v1359_v23  ;;  %v1363_v16 = vpop.eup %1362  ;;  %1376 = vpow2.f32 %v937_v3 }
 0x363   : > { %v935_v49 = vmul.f32 1.442695, %v838_v33  ;;  %v933_v8 = vmul.f32 1.442695, %v837_v25  ;;  %v1365_v48 = vpop.eup %1364 }
 0x365   : > { %1050 = vmatpush2.xpose.msra.mxu0 %v1361_v51  ;;  %1378 = vpow2.f32 %v935_v49 }
 0x366   : > { %1051 = vmatprep.subr.mxu0 %v1363_v16  ;;  %v1367_v17 = vpop.eup %1366  ;;  %1380 = vpow2.f32 %v933_v8 }
 0x367   : > { %v1369_v9 = vpop.eup %1368 }
 0x368   : > { %v189_v61 = vpop.permute.xlu0 %188 }
 0x369   : > { %v289_v46 = vadd.f32 %v288_v62, %v189_v61  ;;  %1052 = vmatpush2.xpose.msra.mxu0 %v1365_v48  ;;  %v287_v14 = vadd.f32 %v286_v32, %v189_v61 }
 0x36a   : > { %1053 = vmatprep.subr.mxu0 %v1367_v17  ;;  %v1371_v27 = vpop.eup %1370 }
 0x36b   : > { %1061 = vmatprep.mubr.f32.mxu0 %v289_v46  ;;  %v1373_v24 = vpop.eup %1372 }
 0x36d   : > { %1054 = vmatpush2.xpose.msra.mxu0 %v1369_v9 }
 0x36e   : > { %1055 = vmatprep.subr.mxu0 %v1371_v27  ;;  %v1375_v45 = vpop.eup %1374 }
 0x36f   : > { %v1377_v60 = vpop.eup %1376 }
 0x371   : > { %1056 = vmatpush2.xpose.msra.mxu0 %v1373_v24 }
 0x372   : > { %1057 = vmatprep.subr.mxu0 %v1375_v45  ;;  %v1379_v52 = vpop.eup %1378 }
 0x373   : > { %v1381_v43 = vpop.eup %1380 }
 0x375   : > { %1058 = vmatpush2.xpose.msra.mxu0 %v1377_v60 }
 0x376   : > { %1059 = vmatprep.subr.mxu0 %v1379_v52 }
 0x379   : > { %1060 = vmatpush2.xpose.msra.mxu0 %v1381_v43 }
 0x37c   : > { %1062 = vmatmul.mubr.f32.vlgmr.msra.gmra.mxu0 %v287_v14 }
 0x43c   : > { %v1063_v59 = vpop.f32.mrf.mxu0 }
 0x43d   : > { %1382 = vrcp.f32 %v1063_v59 }
 0x43e   : > { %v1065_v55 = vpop.f32.mrf.mxu0 }
 0x43f   : > { %1384 = vrcp.f32 %v1065_v55 }
 0x44a   : > { %v1383_v40 = vpop.eup %1382 }
 0x44b   : > { %v1073_v7 = vrot.slane %v1383_v40, %v1072_v6 }
 0x44c   : > { %v1385_v41 = vpop.eup %1384 }
 0x44d   : > { %v1077_v15 = vrot.slane %v1385_v41, %v1072_v6  ;;  %v1078_v39 = vmul.f32 %v1073_v7, %v1063_v59 }
 0x44f   : > { %v1079_v58 = vmul.f32 %v1077_v15, %v1065_v55 }
 0x451   : > { %v1082_v21 = vcombine.low %v1078_v39, %v1079_v58 }
 0x453   : > { %v1084_v37 = vadd.f32 %v1386_v22, %v1082_v21 }
 0x455   : > { %1085 = vst [vmem:[%s163_s26] sm:$0xff] %v1084_v37 }
 0x456   : > { %1400 = shalt.err (!%p1397_p3)
}
 0x457   : > { %s1401_s5 = scalar_lea.hbm %s1099_s30, 128  ;;  %s1405_s11 = scalar_lea.hbm %s1910_s3, 256 }
 0x458   : > { %p1402_p4 = scmp.ne.s32.totalorder %s1099_s30, %s1401_s5  ;;  %p1406_p9 = scmp.lt.s32.totalorder %s1099_s30, %s1910_s3 }
 0x459   : > { %p1407_p10 = scmp.lt.s32.totalorder %s1405_s11, %s1401_s5 }
 0x45a   : > { %p1403_p7 = pnand %p1402_p4, %p1510_p5 }
 0x45b   : > { %p1408_p11 = por %p1407_p10, %p1406_p9 }
 0x45c   : > { %p1404_p8 = pneg %p1403_p7 }
 0x45e   : > { %p1409_p12 = pnand %p1408_p11, %p1404_p8 }
 0x460   : > { %1412 = shalt.err (!%p1409_p12)
}
 0x461   : > { %1211 = dma.vmem_to_hbm [thread:$0]  (%p1510_p5), %s1102_s27, 128, %s1099_s30, %s1087_s4  }
 0x462 PF: > { %p1217_p13 = scmp.ge.s32.totalorder %s1447_s15, 2  ;;  %s1113_s20 = sand.u32 1, %s1435_s12  }
 0x463   : > { %s1114_s24 = scalar_lea.sflag [#allocation3], %s1113_s20 }
 0x464   : > { %p1214_p0 = pnand %p1217_p13, %p1514_p6 }
 0x466   : > { %p1215_p1 = pneg %p1214_p0 }
 0x468   : > { %1430 = dma.done.wait (%p1215_p1), %s1114_s24, 128  }
 0x469   : > { %1432 = vsyncadd (%p1215_p1), %s1114_s24, 4294967168  ;;  %p13_p2 = scmp.ge.s32.totalorder %s1497_s18, 4   ;;  %s1949_s12 = smov %s1439_s13 }
 0x46a   : > { %s1950_s13 = smov %s1443_s14  ;;  %s1951_s14 = smov %s1508_s21 }
 0x46b   : > { %s1952_s15 = smov %s1497_s18  ;;  %15 = sbr.rel (!%p13_p2) target bundleno = 3 (0x3), region = 67 }
 0x470   :  { %1119 = vsyncpa [#allocation3], 1 }
 0x471   :  { %1121 = vsyncpa [#allocation3 + $0x1], 1 }

</bundles_post_ra>
